<compile_context>
chip_gen: v7x
topology: tpu7x:2x2x1
jax: 0.10.0
libtpu: 0.0.40
codegen_flags: <defaults>
</compile_context>

<pallas_src>
import functools

import jax
import jax.numpy as jnp
from jax.experimental import pallas as pl
from jax.experimental.pallas import tpu as pltpu


def _reghead_kernel(x_ref, w_ref, b_ref, o_ref, acc_ref, *, y_range, inv_nvars):
    # x_ref:   [tile_dm, num_patch]  one variable, one d_model tile
    # w_ref:   [reg_dim, num_patch]  (num_patch == in_features == d_model)
    # b_ref:   [reg_dim, 1]
    # o_ref:   [reg_dim, tile_dm]    transposed (lane-dense); wrapper transposes back
    # acc_ref: [tile_dm, num_patch]  f32 scratch: running sum over nvars
    v = pl.program_id(2)

    @pl.when(v == 0)
    def _():
        acc_ref[...] = jnp.zeros_like(acc_ref)

    # Accumulate the nvars sum in f32 (per-tile upcast only, no whole-slab cast).
    acc_ref[...] += x_ref[...].astype(jnp.float32)

    @pl.when(v == pl.num_programs(2) - 1)
    def _():
        # yT[r, d] = sum_p w[r, p] * x_sum[d, p]   (no in-kernel transpose of w)
        y_t = jax.lax.dot_general(
            w_ref[...].astype(jnp.float32),
            acc_ref[...],
            dimension_numbers=(((1,), (1,)), ((), ())),
            preferred_element_type=jnp.float32,
        )
        # Apply mean scale on the small result, then bias (broadcast over lanes).
        y_t = y_t * inv_nvars + b_ref[...].astype(jnp.float32)
        if y_range is not None:
            low, high = y_range
            y_t = low + (high - low) * jax.nn.sigmoid(y_t)   # SigmoidRange
        o_ref[...] = y_t.astype(o_ref.dtype)


def _pick_dm_tile(d_model):
    # Prefer MXU/lane-friendly tiles; fall back to the full dim (always legal).
    if d_model % 256 == 0:
        return 256
    if d_model % 128 == 0:
        return 128
    return d_model


def reg_head(x, weight, bias, y_range=None):
    """x: [bs, nvars, d_model, num_patch]; weight: [reg_dim, d_model]; bias: [reg_dim]."""
    bs, nvars, d_model, num_patch = x.shape
    reg_dim, in_features = weight.shape
    assert num_patch == in_features, (
        "PyTorch code applies Linear(d_model, reg_dim) to the last axis; "
        "requires num_patch == d_model")

    tile_dm = _pick_dm_tile(d_model)
    n_dm = d_model // tile_dm

    bias2d = bias.reshape(reg_dim, 1)  # broadcasts across the d_model lanes

    kernel = functools.partial(_reghead_kernel, y_range=y_range,
                               inv_nvars=1.0 / float(nvars))

    # Kernel emits the transposed, lane-dense layout [bs, reg_dim, d_model].
    y_t = pl.pallas_call(
        kernel,
        out_shape=jax.ShapeDtypeStruct((bs, reg_dim, d_model), x.dtype),
        grid_spec=pltpu.PrefetchScalarGridSpec(
            num_scalar_prefetch=0,
            grid=(bs, n_dm, nvars),
            in_specs=[
                # one (batch, var, d_model-tile) slab per step
                pl.BlockSpec((None, None, tile_dm, num_patch),
                             lambda b, m, v: (b, v, m, 0)),
                pl.BlockSpec((reg_dim, num_patch), lambda b, m, v: (0, 0)),
                pl.BlockSpec((reg_dim, 1), lambda b, m, v: (0, 0)),
            ],
            out_specs=pl.BlockSpec((None, reg_dim, tile_dm),
                                   lambda b, m, v: (b, 0, m)),
            scratch_shapes=[pltpu.VMEM((tile_dm, num_patch), jnp.float32)],
        ),
        compiler_params=pltpu.CompilerParams(
            dimension_semantics=("parallel", "parallel", "arbitrary")),
    )(x, weight, bias2d)

    # Layout plumbing back to the PyTorch result layout [bs, d_model, reg_dim].
    return jnp.transpose(y_t, (0, 2, 1))


if __name__ == "__main__":
    # Small shapes consistent with the module (num_patch == d_model required by the code).
    bs, nvars, d_model, num_patch, reg_dim = 2, 4, 16, 16, 1

    key = jax.random.PRNGKey(0)
    kx, kw, kb = jax.random.split(key, 3)

    x = jax.random.normal(kx, (bs, nvars, d_model, num_patch), dtype=jnp.float32)
    # Deterministic Linear params (synthetic init, uniform like PyTorch default range).
    bound = 1.0 / jnp.sqrt(d_model)
    weight = jax.random.uniform(kw, (reg_dim, d_model), minval=-bound, maxval=bound,
                                dtype=jnp.float32)
    bias = jax.random.uniform(kb, (reg_dim,), minval=-bound, maxval=bound,
                              dtype=jnp.float32)

    # Plain-JAX reference of the exact PyTorch forward.
    ref = jnp.mean(x, axis=1) @ weight.T + bias

    # y_range=None path
    y = reg_head(x, weight, bias, y_range=None)
    y = jax.block_until_ready(y)
    assert y.shape == (bs, d_model, reg_dim)
    assert jnp.allclose(y, ref, atol=1e-5, rtol=1e-5)

    # SigmoidRange path
    y_rng = reg_head(x, weight, bias, y_range=(0.0, 1.0))
    y_rng = jax.block_until_ready(y_rng)
    ref_rng = 0.0 + (1.0 - 0.0) * jax.nn.sigmoid(ref)
    assert jnp.allclose(y_rng, ref_rng, atol=1e-5, rtol=1e-5)

    print("KERNEL_OK")
</pallas_src>

<mosaic_0001>
module attributes {stable_mosaic.version = 11 : i64} {
  func.func @_reghead_kernel(%arg0: i32, %arg1: i32, %arg2: i32, %arg3: memref<1x1x16x16xf32, #tpu.memory_space<vmem>>, %arg4: memref<1x16xf32, #tpu.memory_space<vmem>>, %arg5: memref<1x1xf32, #tpu.memory_space<vmem>>, %arg6: memref<1x1x16xf32, #tpu.memory_space<vmem>>, %arg7: memref<16x16xf32, #tpu.memory_space<vmem>>) attributes {dimension_semantics = [#tpu.dimension_semantics<parallel>, #tpu.dimension_semantics<parallel>, #tpu.dimension_semantics<arbitrary>], iteration_bounds = array<i64: 2, 1, 4>, scalar_prefetch = 0 : i64, scratch_operands = 1 : i64, tpu.core_type = #tpu.core_type<tc>, window_params = [{transform_indices = @transform_0, window_bounds = array<i64: 1, 1, 16, 16>}, {pipeline_mode = #tpu.pipeline_mode<synchronous>, transform_indices = @transform_1, window_bounds = array<i64: 1, 16>}, {pipeline_mode = #tpu.pipeline_mode<synchronous>, transform_indices = @transform_2, window_bounds = array<i64: 1, 1>}, {transform_indices = @transform_3, window_bounds = array<i64: 1, 1, 16>}]} {
    %c0_i32 = arith.constant 0 : i32
    %0 = arith.cmpi eq, %arg2, %c0_i32 : i32
    %1 = arith.extui %0 : i1 to i32
    %c0_i32_0 = arith.constant 0 : i32
    %2 = arith.cmpi ne, %1, %c0_i32_0 : i32
    scf.if %2 {
      %cst = arith.constant 0.000000e+00 : f32
      %11 = vector.broadcast %cst : f32 to vector<16x16xf32>
      %c0_9 = arith.constant 0 : index
      %c0_10 = arith.constant 0 : index
      %12 = vector.load %arg7[%c0_9, %c0_10] : memref<16x16xf32, #tpu.memory_space<vmem>>, vector<16x16xf32>
      tpu.vector_store %arg7[%c0_9, %c0_10], %11 {strides = array<i32>} : memref<16x16xf32, #tpu.memory_space<vmem>>, vector<16x16xf32>,
    } else {
    }
    %c0 = arith.constant 0 : index
    %c0_1 = arith.constant 0 : index
    %3 = vector.load %arg7[%c0, %c0_1] : memref<16x16xf32, #tpu.memory_space<vmem>>, vector<16x16xf32>
    %c0_2 = arith.constant 0 : index
    %c0_3 = arith.constant 0 : index
    %c0_4 = arith.constant 0 : index
    %c0_5 = arith.constant 0 : index
    %4 = vector.load %arg3[%c0_2, %c0_3, %c0_4, %c0_5] : memref<1x1x16x16xf32, #tpu.memory_space<vmem>>, vector<1x1x16x16xf32>
    %5 = vector.shape_cast %4 : vector<1x1x16x16xf32> to vector<16x16xf32>
    %6 = arith.addf %3, %5 : vector<16x16xf32>
    %c0_6 = arith.constant 0 : index
    %c0_7 = arith.constant 0 : index
    %7 = vector.load %arg7[%c0_6, %c0_7] : memref<16x16xf32, #tpu.memory_space<vmem>>, vector<16x16xf32>
    tpu.vector_store %arg7[%c0_6, %c0_7], %6 {strides = array<i32>} : memref<16x16xf32, #tpu.memory_space<vmem>>, vector<16x16xf32>,
    %c3_i32 = arith.constant 3 : i32
    %8 = arith.cmpi eq, %arg2, %c3_i32 : i32
    %9 = arith.extui %8 : i1 to i32
    %c0_i32_8 = arith.constant 0 : i32
    %10 = arith.cmpi ne, %9, %c0_i32_8 : i32
    scf.if %10 {
      %c0_9 = arith.constant 0 : index
      %c0_10 = arith.constant 0 : index
      %11 = vector.load %arg4[%c0_9, %c0_10] : memref<1x16xf32, #tpu.memory_space<vmem>>, vector<1x16xf32>
      %c0_11 = arith.constant 0 : index
      %c0_12 = arith.constant 0 : index
      %12 = vector.load %arg7[%c0_11, %c0_12] : memref<16x16xf32, #tpu.memory_space<vmem>>, vector<16x16xf32>
      %cst = arith.constant dense<0.000000e+00> : vector<1x16xf32>
      %13 = tpu.matmul %11, %12, %cst {dimension_numbers = #tpu.dot_dimension_numbers<[1], [1], [0], [0], [0, 0, 1, 0], [], []>} : vector<1x16xf32>, vector<16x16xf32>, vector<1x16xf32> -> vector<1x16xf32>
      %cst_13 = arith.constant 2.500000e-01 : f32
      %14 = vector.broadcast %cst_13 : f32 to vector<1x16xf32>
      %15 = arith.mulf %13, %14 : vector<1x16xf32>
      %c0_14 = arith.constant 0 : index
      %c0_15 = arith.constant 0 : index
      %16 = vector.load %arg5[%c0_14, %c0_15] : memref<1x1xf32, #tpu.memory_space<vmem>>, vector<1x1xf32>
      %17 = vector.broadcast %16 : vector<1x1xf32> to vector<1x16xf32>
      %18 = arith.addf %15, %17 : vector<1x16xf32>
      %c0_16 = arith.constant 0 : index
      %c0_17 = arith.constant 0 : index
      %c0_18 = arith.constant 0 : index
      %19 = vector.load %arg6[%c0_16, %c0_17, %c0_18] : memref<1x1x16xf32, #tpu.memory_space<vmem>>, vector<1x1x16xf32>
      %20 = vector.shape_cast %19 : vector<1x1x16xf32> to vector<1x16xf32>
      %21 = vector.shape_cast %18 : vector<1x16xf32> to vector<1x1x16xf32>
      tpu.vector_store %arg6[%c0_16, %c0_17, %c0_18], %21 {strides = array<i32>} : memref<1x1x16xf32, #tpu.memory_space<vmem>>, vector<1x1x16xf32>,
    } else {
    }
    return
  }
  func.func @transform_0(%arg0: i32, %arg1: i32, %arg2: i32) -> (i32, i32, i32, i32) {
    %c0_i32 = arith.constant 0 : i32
    %c0_i32_0 = arith.constant 0 : i32
    return %arg0, %arg2, %arg1, %c0_i32 : i32, i32, i32, i32
  }
  func.func @transform_1(%arg0: i32, %arg1: i32, %arg2: i32) -> (i32, i32) {
    %c0_i32 = arith.constant 0 : i32
    %c0_i32_0 = arith.constant 0 : i32
    %c0_i32_1 = arith.constant 0 : i32
    return %c0_i32, %c0_i32_0 : i32, i32
  }
  func.func @transform_2(%arg0: i32, %arg1: i32, %arg2: i32) -> (i32, i32) {
    %c0_i32 = arith.constant 0 : i32
    %c0_i32_0 = arith.constant 0 : i32
    %c0_i32_1 = arith.constant 0 : i32
    return %c0_i32, %c0_i32_0 : i32, i32
  }
  func.func @transform_3(%arg0: i32, %arg1: i32, %arg2: i32) -> (i32, i32, i32) {
    %c0_i32 = arith.constant 0 : i32
    %c0_i32_0 = arith.constant 0 : i32
    return %arg0, %c0_i32, %arg1 : i32, i32, i32
  }
}

</mosaic_0001>

<bundles_post_ra>
// kernel: tpu_custom_call.1
= control target key start
LH: loop header
LB: loop body
LE: loop exit
PB: predicated region body
PF: predicated region fallthrough
CT: control target
= control target key end

     0   :  { %s993_s0 = inlined_call_operand.hbm [shape: f32[2,4,16,16], index: 0, kind: input, shape index: {}]   ;;  %s994_s1 = inlined_call_operand.vmem [shape: f32[1,16], index: 1, kind: input, shape index: {}]   ;;  %s995_s2 = inlined_call_operand.<no memory space> [shape: f32[1,1], index: 2, kind: input, shape index: {}]   ;;  %s996_s3 = inlined_call_operand.hbm [shape: f32[2,1,16], index: 3, kind: output, shape index: {}]  }
   0x1   :  { %v8_v0 = vstv %s995_s2 }
   0x2   :  { %9 = vst [vmem:[#allocation3] sm:$0x1] %v8_v0 }
   0x3   :  { %10 = vsyncpa [#allocation5], 0 }
   0x4   :  { %12 = vsyncpa [#allocation5 + $0x1], 0 }
   0x5   :  { %13 = vsyncpa [#allocation6], 0 }
   0x6   :  { %15 = vsyncpa [#allocation6 + $0x1], 0  ;;  %s764_s14 = smov 0   ;;  %s766_s15 = smov 0  }
   0x7   :  { %s768_s16 = smov 0   ;;  %s770_s17 = smov 0  }
   0x8   :  { %s772_s18 = smov 0   ;;  %s774_s19 = smov 0  }
   0x9   :  { %s776_s20 = smov 0   ;;  %s778_s2 = smov 0  }
   0xa   :  { %s780_s21 = smov 0   ;;  %s782_s22 = smov 0  }
   0xb   :  { %s784_s23 = smov 0  }
   0xc LB: > { %s436_s24 = sadd.s32 4294967295, %s730_s23   ;;  %s437_s25 = sadd.s32 4294967294, %s730_s23   ;;  %s730_s23 = sphi %s784_s23, %s21_s23   ;;  %s726_s22 = sphi %s782_s22, %s1020_s22   ;;  %s722_s21 = sphi %s780_s21, %s1019_s21   ;;  %s718_s2 = sphi %s778_s2, %s1018_s2   ;;  %s714_s20 = sphi %s776_s20, %s1017_s20   ;;  %s710_s19 = sphi %s774_s19, %s1016_s19   ;;  %s706_s18 = sphi %s772_s18, %s1015_s18   ;;  %s702_s17 = sphi %s770_s17, %s1014_s17   ;;  %s698_s16 = sphi %s768_s16, %s1013_s16   ;;  %s694_s15 = sphi %s766_s15, %s1012_s15   ;;  %s690_s14 = sphi %s764_s14, %s1011_s14  }
   0xd   : > { %s33_s26 = sadd.s32 1, %s722_s21  ;;  %s40_s27 = sadd.s32 1, %s726_s22 }
   0xe   : > { %p34_p0 = scmp.ge.s32.totalorder %s33_s26, 4  ;;  %s51_s28 = sadd.s32 1, %s710_s19 }
   0xf   : > { %p58_p1 = scmp.ne.s32.totalorder %s710_s19, %s706_s18  ;;  %p59_p2 = scmp.eq.s32.totalorder %s730_s23, 0 }
  0x10   : > { %s1022_s26 = smov (%p34_p0, %s33_s26), 0  ;;  %s1024_s27 = smov (!%p34_p0, %s40_s27), %s726_s22 }
  0x11   : > { %1000 = sst [smem:[#allocation10_spill]] %s1022_s26  ;;  %s45_s29 = ssub.s32 %s722_s21, %s1022_s26 }
  0x12   : > { %p830_p3 = por %p59_p2, %p58_p1  ;;  %p42_p4 = scmp.ge.s32.totalorder %s1024_s27, 2 }
  0x13   : > { %p64_p5 = scmp.ne.s32.totalorder %s706_s18, %s702_s17  ;;  %p65_p6 = scmp.eq.s32.totalorder %s436_s24, 0 }
  0x14   : > { %s121_s4 = sadd.s32 1, %s698_s16  ;;  %s1026_s27 = smov (%p42_p4, %s1024_s27), 0 }
  0x15   : > { %1002 = sst [smem:[#allocation11_spill]] %s1026_s27  ;;  %p838_p7 = por %p65_p6, %p64_p5 }
  0x16   : > { %p131_p8 = scmp.ne.s32.totalorder %s698_s16, %s694_s15  ;;  %s44_s6 = ssub.s32 %s726_s22, %s1026_s27 }
  0x17   : > { %p132_p9 = scmp.eq.s32.totalorder %s436_s24, 7  ;;  %s46_s7 = sor.u32 %s45_s29, %s44_s6 }
  0x18   : > { %p119_p10 = scmp.eq.s32.totalorder %s44_s6, 0  ;;  %p49_p11 = scmp.eq.s32.totalorder %s46_s7, 0 }
  0x19   : > { %p846_p12 = por %p132_p9, %p131_p8  ;;  %p137_p13 = scmp.ne.s32.totalorder %s694_s15, %s690_s14 }
  0x1a   : > { %s851_s9 = scalar_select %p119_p10, %s698_s16, %s121_s4  }
  0x1b   : > { %s1004_s8 = scalar_select %p846_p12, 1, 0 }
  0x1c   : > { %s854_s10 = scalar_select %p49_p11, %s710_s19, %s51_s28  }
  0x1d   : > { %p138_p0 = scmp.eq.s32.totalorder %s437_s25, 7  ;;  %p480_p1 = scmp.lt.s32.totalorder %s730_s23, 8 }
  0x1e   : > { %s164_s12 = sand.u32 1, %s710_s19   ;;  %s441_s17 = sshll.u32 %s722_s21, 1 }
  0x1f   : > { %p859_p2 = por %p138_p0, %p137_p13  ;;  %s440_s13 = sshll.u32 %s164_s12, 4 }
  0x20   : > { %s442_s24 = sshll.u32 %s726_s22, 3  ;;  %s168_s29 = scalar_lea.vmem [#allocation4], %s440_s13 }
  0x21   : > { %s1005_s11 = scalar_select %p859_p2, 1, 0 }
  0x22   : > { %s179_s6 = sshll.u32 %s168_s29, 4  ;;  %s176_s7 = sadd.s32 %s442_s24, %s441_s17  ;;  %s866_s6 = int_to_ptr.vmem [resolvable:$true] %s179_s6 }
  0x23   : > { %s443_s4 = sshll.u32 %s176_s7, 7  ;;  %p870_p4 = pnand %p480_p1, %p830_p3 }
  0x24   : > { %s877_s26 = scalar_lea.hbm %s993_s0, %s443_s4  ;;  %s879_s13 = scalar_lea.sflag [#allocation5], %s164_s12 }
  0x25   : > { %s578_s17 = scalar_lea.hbm %s877_s26, 256  ;;  %p580_p3 = pneg %p870_p4 }
  0x26   : > { %p579_p5 = scmp.ne.s32.totalorder %s877_s26, %s578_s17  ;;  %s583_s24 = scalar_lea.hbm %s993_s0, 2048 }
  0x27   : > { %p584_p9 = scmp.lt.u32.totalorder %s877_s26, %s993_s0  ;;  %p585_p10 = scmp.lt.u32.totalorder %s583_s24, %s578_s17 }
  0x28   : > { %p581_p6 = pnand %p580_p3, %p579_p5  ;;  %p587_p13 = scmp.lt.u32.totalorder %s578_s17, %s877_s26 }
  0x29   : > { %p586_p11 = por %p585_p10, %p584_p9 }
  0x2a   : > { %p582_p8 = pneg %p581_p6 }
  0x2b   : > { %p588_p0 = por %p587_p13, %p586_p11 }
  0x2d   : > { %p589_p1 = pnand %p588_p0, %p582_p8 }
  0x2f   : > { %592 = shalt.err (!%p589_p1)
}
  0x30   : > { %s593_s12 = scalar_lea.vmem %s866_s6, 256  ;;  %s732_s4 = smov [#allocation4]  }
  0x31   : > { %p594_p5 = scmp.ne.s32.totalorder %s866_s6, %s593_s12  ;;  %s598_s25 = sshll.u32 %s732_s4, 4  ;;  %s599_s25 = int_to_ptr.vmem [resolvable:$false] %s598_s25 }
  0x32   : > { %s600_s30 = scalar_lea.vmem %s599_s25, 512  ;;  %p601_p12 = scmp.lt.s32.totalorder %s866_s6, %s599_s25 }
  0x33   : > { %p596_p6 = pnand %p594_p5, %p580_p3  ;;  %p602_p9 = scmp.lt.s32.totalorder %s600_s30, %s593_s12 }
  0x35   : > { %p597_p2 = pneg %p596_p6  ;;  %p603_p10 = por %p602_p9, %p601_p12 }
  0x37   : > { %p604_p11 = pnand %p603_p10, %p597_p2 }
  0x39   : > { %607 = shalt.err (!%p604_p11)
}
  0x3a   : > { %s733_s17 = smov 128   ;;  %s734_s27 = smov 8  }
  0x3b   : > { %475 = dma.hbm_to_vmem [thread:$0]  (!%p870_p4), %s877_s26, 256, %s866_s6, %s879_s13, %s733_s17, %s733_s17, %s734_s27  }
  0x3c   : > { %p444_p3 = scmp.ge.s32.totalorder %s730_s23, 1  ;;  %p187_p8 = scmp.lt.s32.totalorder %s730_s23, 9 }
  0x3e   : > { %p188_p13 = pnand %p444_p3, %p187_p8 }
  0x3f   : > { %s193_s24 = sand.u32 (!%p188_p13), 1, %s706_s18  }
  0x40   : > { %191 = sbr.rel (%p188_p13) target bundleno = 344 (0x158), region = 32  ;;  %s445_s29 = sshll.u32 (!%p188_p13), %s193_s24, 4 }
  0x41   : > { %s194_s7 = scalar_lea.sflag (!%p188_p13), [#allocation5], %s193_s24  ;;  %s197_s12 = scalar_lea.vmem (!%p188_p13), [#allocation4], %s445_s29 }
  0x47   : > { %681 = dma.done.wait (%p838_p7), %s194_s7, 256  }
  0x48   : > { %683 = vsyncadd (%p838_p7), %s194_s7, 4294967040  ;;  %s217_s4 = sand.u32 1, %s694_s15   ;;  %p446_p12 = scmp.ne.s32.totalorder %s714_s20, 0 }
  0x49   : > { %s917_s26 = scalar_lea.vmem [#allocation7], %s217_s4  ;;  %vm224_vm0 = vcmask (!%p446_p12), 130048   ;;  %v735_v1 = vmov (!%p446_p12), 0.0  }
  0x4a   : > { %223 = sbr.rel (%p446_p12) target bundleno = 81 (0x51), region = 40  ;;  %225 = vst.msk [vmem:[#allocation2] sm:$0xff] (!%p446_p12), %vm224_vm0, %v735_v1  ;;  %226 = vst.msk [vmem:[#allocation2 + $0x8] sm:$0xff] (!%p446_p12), %vm224_vm0, %v735_v1 }
  0x51 PF: > { %v227_v2 = vld [vmem:[#allocation2] sm:$0xff]  ;;  %vm233_vm1 = vcmask 130048   ;;  %v228_v4 = vld [vmem:[#allocation2 + $0x8] sm:$0xff]  ;;  %p447_p7 = scmp.ne.s32.totalorder %s714_s20, 3 }
  0x52   : > { %v229_v3 = vld [vmem:[%s197_s12] sm:$0xff]  ;;  %v230_v6 = vld [vmem:[%s197_s12 + $0x8] sm:$0xff]  ;;  %vm466_vm2 = vmpackc.low (!%p447_p7), %vm233_vm1, %vm233_vm1  ;;  %v736_v10 = vmov (!%p447_p7), 0.0|0.0   ;;  %vm737_vm3 = vmmov (!%p447_p7), 0   ;;  %v738_v12 = vmov (!%p447_p7), 0.0   ;;  %v739_v14 = vmov (!%p447_p7), 0  }
  0x53   : > { %v231_v5 = vadd.f32 %v229_v3, %v227_v2  ;;  %v232_v7 = vadd.f32 %v230_v6, %v228_v4  ;;  %239 = sbr.rel (%p447_p7) target bundleno = 319 (0x13f), region = 44  ;;  %464 = vmatprep.subr.bf16.mxu0 (!%p447_p7), %v736_v10  ;;  %461 = vmatprep.mubr.msk.f32.mxu0 (!%p447_p7), %vm737_vm3, %v738_v12  ;;  %v323_v13 = vld [vmem:[#allocation3] sm:$0x1] (!%p447_p7)  ;;  %v240_v15 = vld [vmem:[%s994_s1] sm:$0x1] (!%p447_p7)  ;;  %v329_v16 = vlaneseq (!%p447_p7)  ;;  %vm334_vm4 = vcmask (!%p447_p7), 122880  }
  0x54   : > { %577 = vset.pattern.permute.xlu0 (!%p447_p7), %v739_v14 }
  0x55   : > { %234 = vst.msk [vmem:[#allocation2] sm:$0xff] %vm233_vm1, %v231_v5  ;;  %235 = vst.msk [vmem:[#allocation2 + $0x8] sm:$0xff] %vm233_vm1, %v232_v7  ;;  %326 = vperm.xlu0 (!%p447_p7), %577, %v323_v13   ;;  %v330_v17 = vshrl.u32 (!%p447_p7), %v329_v16, 7 }
  0x57   : > { %v331_v18 = vsub.s32 (!%p447_p7), 0, %v330_v17 }
  0x5c   : > { %v241_v8 = vld [vmem:[#allocation2] sm:$0xff]  ;;  %v242_v9 = vld [vmem:[#allocation2 + $0x8] sm:$0xff] }
  0x5d   : > { %v465_v11 = vpack.c.bf16 %v242_v9, %v241_v8 }
  0x5f   : > { %467 = vmatpush3.bf16.xpose.msk.msra.mxu0 %vm466_vm2, %v465_v11 }
  0x66   : > { %462 = vmatmul.mubr.msk.f32.vlgmr.msra.gmra.mrb[0].mxu0 %vm233_vm1, %v240_v15 }
  0xd4   : > { %v327_v19 = vpop.permute.xlu0 %326 }
  0xd5   : > { %v332_v20 = vrot.slane %v327_v19, %v331_v18 }
 0x139   : > { %v318_v21 = vpop.f32.mrb[0].mxu0 }
 0x13a   : > { %v322_v22 = vmul.f32 0.25, %v318_v21  ;;  %v463_v23 = vpop.f32.mrb[1].mxu0 }
 0x13c   : > { %v333_v24 = vadd.f32 %v332_v20, %v322_v22 }
 0x13e   : > { %335 = vst.msk [vmem:[%s917_s26] sm:$0x1] %vm334_vm4, %v333_v24 }
 0x13f PF: > { %s451_s6 = sshll.u32 %s718_s2, 4  ;;  %s350_s30 = sshll.u32 %s917_s26, 4  ;;  %s351_s30 = int_to_ptr.vmem [resolvable:$true] %s350_s30 }
 0x140   : > { %s934_s25 = scalar_lea.hbm %s996_s3, %s451_s6  ;;  %s337_s17 = scalar_lea.sflag [#allocation6], %s217_s4 }
 0x141   : > { %s608_s27 = scalar_lea.vmem %s351_s30, 16  ;;  %p1007_p4 = scmp.ne.s32.totalorder %s1004_s8, 0 }
 0x142   : > { %p609_p2 = scmp.ne.s32.totalorder %s351_s30, %s608_s27  ;;  %s740_s24 = smov [#allocation7]  }
 0x143   : > { %s612_s29 = sshll.u32 %s740_s24, 4  ;;  %s613_s29 = int_to_ptr.vmem [resolvable:$false] %s612_s29 }
 0x144   : > { %p610_p0 = pnand %p609_p2, %p1007_p4  ;;  %s614_s7 = scalar_lea.vmem %s613_s29, 32 }
 0x145   : > { %p615_p5 = scmp.lt.s32.totalorder %s351_s30, %s613_s29  ;;  %p616_p6 = scmp.lt.s32.totalorder %s614_s7, %s608_s27 }
 0x146   : > { %p611_p1 = pneg %p610_p0 }
 0x147   : > { %p617_p9 = por %p616_p6, %p615_p5 }
 0x149   : > { %p618_p10 = pnand %p617_p9, %p611_p1 }
 0x14b   : > { %621 = shalt.err (!%p618_p10)
}
 0x14c   : > { %s622_s2 = scalar_lea.hbm %s934_s25, 16  ;;  %s626_s26 = scalar_lea.hbm %s996_s3, 32 }
 0x14d   : > { %p623_p11 = scmp.ne.s32.totalorder %s934_s25, %s622_s2  ;;  %p627_p13 = scmp.lt.u32.totalorder %s934_s25, %s996_s3 }
 0x14e   : > { %p628_p12 = scmp.lt.u32.totalorder %s626_s26, %s622_s2  ;;  %p630_p2 = scmp.lt.u32.totalorder %s622_s2, %s934_s25 }
 0x14f   : > { %p624_p3 = pnand %p623_p11, %p1007_p4 }
 0x150   : > { %p629_p7 = por %p628_p12, %p627_p13 }
 0x151   : > { %p625_p8 = pneg %p624_p3 }
 0x152   : > { %p631_p0 = por %p630_p2, %p629_p7 }
 0x154   : > { %p632_p1 = pnand %p631_p0, %p625_p8 }
 0x156   : > { %635 = shalt.err (!%p632_p1)
}
 0x157   : > { %470 = dma.vmem_to_hbm [thread:$0]  (%p1007_p4), %s351_s30, 16, %s934_s25, %s337_s17  }
 0x158 PF: > { %p481_p5 = scmp.ge.s32.totalorder %s730_s23, 2  ;;  %s362_s6 = sand.u32 1, %s690_s14  }
 0x159   : > { %p1008_p6 = scmp.ne.s32.totalorder %s1005_s11, 0  ;;  %s363_s28 = scalar_lea.sflag [#allocation6], %s362_s6 }
 0x15b   : > { %p477_p9 = pnand %p481_p5, %p1008_p6 }
 0x15d   : > { %685 = dma.done.wait (!%p477_p9), %s363_s28, 16  }
 0x15e   : > { %687 = vsyncadd (!%p477_p9), %s363_s28, 4294967280  ;;  %s21_s23 = sadd.s32 1, %s730_s23   ;;  %s1009_s8 = sld [smem:[#allocation10_spill]] }
 0x15f   : > { %p18_p10 = scmp.ge.s32.totalorder %s21_s23, 10   ;;  %s1010_s13 = sld [smem:[#allocation11_spill]] }
 0x160   : > { %s1011_s14 = smov %s694_s15  ;;  %s1012_s15 = smov %s698_s16 }
 0x161   : > { %s1013_s16 = smov %s851_s9  ;;  %s1014_s17 = smov %s706_s18 }
 0x162   : > { %s1015_s18 = smov %s710_s19  ;;  %s1016_s19 = smov %s854_s10 }
 0x163   : > { %s1017_s20 = smov %s722_s21  ;;  %s1018_s2 = smov %s726_s22 }
 0x164   : > { %s1019_s21 = smov %s1009_s8  ;;  %20 = sbr.rel (!%p18_p10) target bundleno = 12 (0xc), region = 85 }
 0x165   : > { %s1020_s22 = smov %s1010_s13 }
 0x16b   :  { %367 = vsyncpa [#allocation5], 1 }
 0x16c   :  { %369 = vsyncpa [#allocation5 + $0x1], 1 }
 0x16d   :  { %370 = vsyncpa [#allocation6], 1 }
 0x16e   :  { %372 = vsyncpa [#allocation6 + $0x1], 1 }

</bundles_post_ra>
